<compile_context>
chip_gen: v7x
topology: tpu7x:2x2x1
jax: 0.10.0
libtpu: 0.0.40
codegen_flags: <defaults>
</compile_context>

<pallas_src>
import jax
import jax.numpy as jnp
from jax import lax
from jax.experimental import pallas as pl
from jax.experimental.pallas import tpu as pltpu


def embedding_kernel(ids_ref, tok_tab_ref, pos_tab_ref, out_ref):
    # ids_ref:     (1, 1, TILE_R) int32 VMEM -- token ids for this row tile
    # tok_tab_ref: (V, D) float32 VMEM       -- full token table (resident)
    # pos_tab_ref: (T, D) float32 VMEM       -- positional rows 0..T-1 (resident)
    # out_ref:     (TILE_R, D) float32       -- tok_embed + pos_embed slab
    tile_r = out_ref.shape[0]
    V = tok_tab_ref.shape[0]
    T = pos_tab_ref.shape[0]

    # Vectorized one-hot gather on the MXU: (TILE_R, V) @ (V, D) -> (TILE_R, D).
    # One-hot is built once per grid step, in the matmul input dtype.
    # Note: out-of-range / negative ids yield an all-zero row (no match),
    # unlike torch.nn.Embedding which would raise.
    ids = ids_ref[0, 0, :]                                          # (TILE_R,)
    iota_v = lax.broadcasted_iota(jnp.int32, (tile_r, V), 1)        # (TILE_R, V)
    onehot = (ids[:, None] == iota_v).astype(tok_tab_ref.dtype)     # (TILE_R, V)
    tok = jnp.dot(onehot, tok_tab_ref[...],
                  preferred_element_type=jnp.float32)               # (TILE_R, D)

    # Tile rows are aligned to T, so positions repeat every T rows in the tile.
    pos = jnp.tile(pos_tab_ref[...], (tile_r // T, 1))              # (TILE_R, D)

    # Single unmasked lane-dense store.
    out_ref[...] = (tok + pos).astype(out_ref.dtype)
    # TODO(synk): dropout is identity (eval mode); training-mode dropout would
    # use pltpu.prng_seed + pltpu.prng_random_bits with 1/(1-p) scaling.


def _choose_tile_rows(B, T, max_rows=256):
    """Rows per grid step: multiple of T, fat (<=max_rows), >=2 steps if B>1."""
    seqs_per_step = max(1, min(B, max_rows // T))
    # Keep at least two grid steps when possible so v7x's two TensorCores
    # (dimension_semantics="parallel") both get work.
    if seqs_per_step >= B and B > 1:
        seqs_per_step = B // 2
    # Avoid a ragged last tile.
    while B % seqs_per_step != 0:
        seqs_per_step -= 1
    return seqs_per_step * T


def embedding_layer(x_ids, tok_table, pos_table, *, max_tile_rows=256):
    B, T = x_ids.shape
    V, D = tok_table.shape
    assert T <= pos_table.shape[0], "sequence length exceeds n_ctx"

    tile_r = _choose_tile_rows(B, T, max_tile_rows)
    num_tiles = (B * T) // tile_r

    pos_slice = pos_table[:T, :]                              # (T, D) static slice
    ids = x_ids.astype(jnp.int32).reshape(num_tiles, 1, tile_r)

    # Explicit VMEM budget: resident table + pos (single-buffered), ids and
    # output double-buffered, per-step one-hot workspace, plus slack.
    tab_item = jnp.dtype(tok_table.dtype).itemsize
    vmem_budget = (
        V * D * tab_item                 # token table (Buffered(1))
        + T * D * tab_item               # positional rows (Buffered(1))
        + 2 * tile_r * 4                 # ids tile, double-buffered
        + 2 * tile_r * D * 4             # output tile, double-buffered
        + tile_r * V * 4                 # one-hot workspace
        + (4 << 20))                     # slack
    vmem_limit = int(max(vmem_budget, 32 << 20))

    out_flat = pl.pallas_call(
        embedding_kernel,
        out_shape=jax.ShapeDtypeStruct((B * T, D), jnp.float32),
        grid_spec=pltpu.PrefetchScalarGridSpec(
            num_scalar_prefetch=0,
            grid=(num_tiles,),
            in_specs=[
                # ids for this row tile
                pl.BlockSpec((1, 1, tile_r), lambda s: (s, 0, 0)),
                # full token table, resident, single-buffered
                pl.BlockSpec((V, D), lambda s: (0, 0),
                             pipeline_mode=pl.Buffered(1)),
                # positional rows, resident, single-buffered
                pl.BlockSpec((T, D), lambda s: (0, 0),
                             pipeline_mode=pl.Buffered(1)),
            ],
            # lane-dense flat output slab; rows s*tile_r .. (s+1)*tile_r-1
            out_specs=pl.BlockSpec((tile_r, D), lambda s: (s, 0)),
        ),
        compiler_params=pltpu.CompilerParams(
            dimension_semantics=("parallel",),
            vmem_limit_bytes=vmem_limit,
        ),
    )(ids, tok_table, pos_slice)

    return out_flat.reshape(B, T, D)


if __name__ == "__main__":
    # config: vocab_size=64, n_ctx=16, d_model=128, dropout (identity at eval)
    VOCAB, N_CTX, D_MODEL = 64, 16, 128
    B, T = 4, 8   # 32 flat rows -> 2 grid steps of a fat (16, 128) tile

    key = jax.random.PRNGKey(0)
    k_tok, k_pos, k_ids = jax.random.split(key, 3)

    tok_table = jax.random.normal(k_tok, (VOCAB, D_MODEL), dtype=jnp.float32)
    pos_table = jax.random.normal(k_pos, (N_CTX, D_MODEL), dtype=jnp.float32)
    x_ids = jax.random.randint(k_ids, (B, T), 0, VOCAB, dtype=jnp.int32)

    out = embedding_layer(x_ids, tok_table, pos_table)
    out = jax.block_until_ready(out)

    # pure-JAX reference check
    ref = tok_table[x_ids] + pos_table[:T][None, :, :]
    assert out.shape == (B, T, D_MODEL)
    assert jnp.allclose(out, ref, atol=1e-5), "mismatch vs reference"

    print("KERNEL_OK")
</pallas_src>

<mosaic_0001>
module attributes {stable_mosaic.version = 11 : i64} {
  func.func @embedding_kernel(%arg0: i32, %arg1: memref<1x1x16xi32, #tpu.memory_space<vmem>>, %arg2: memref<64x128xf32, #tpu.memory_space<vmem>>, %arg3: memref<8x128xf32, #tpu.memory_space<vmem>>, %arg4: memref<16x128xf32, #tpu.memory_space<vmem>>) attributes {dimension_semantics = [#tpu.dimension_semantics<parallel>], iteration_bounds = array<i64: 2>, scalar_prefetch = 0 : i64, scratch_operands = 0 : i64, tpu.core_type = #tpu.core_type<tc>, window_params = [{transform_indices = @transform_0, window_bounds = array<i64: 1, 1, 16>}, {pipeline_mode = #tpu.pipeline_mode<synchronous>, transform_indices = @transform_1, window_bounds = array<i64: 64, 128>}, {pipeline_mode = #tpu.pipeline_mode<synchronous>, transform_indices = @transform_2, window_bounds = array<i64: 8, 128>}, {transform_indices = @transform_3, window_bounds = array<i64: 16, 128>}]} {
    %c0 = arith.constant 0 : index
    %c0_0 = arith.constant 0 : index
    %c0_1 = arith.constant 0 : index
    %0 = vector.load %arg1[%c0, %c0_0, %c0_1] : memref<1x1x16xi32, #tpu.memory_space<vmem>>, vector<1x1x16xi32>
    %1 = vector.shape_cast %0 : vector<1x1x16xi32> to vector<16xi32>
    %2 = tpu.iota {dimensions = array<i32: 1>} : vector<16x64xi32>
    %3 = vector.shape_cast %1 : vector<16xi32> to vector<16x1xi32>
    %4 = vector.broadcast %3 : vector<16x1xi32> to vector<16x64xi32>
    %5 = arith.cmpi eq, %4, %2 : vector<16x64xi32>
    %6 = arith.extui %5 : vector<16x64xi1> to vector<16x64xi32>
    %7 = arith.sitofp %6 : vector<16x64xi32> to vector<16x64xf32>
    %c0_2 = arith.constant 0 : index
    %c0_3 = arith.constant 0 : index
    %8 = vector.load %arg2[%c0_2, %c0_3] : memref<64x128xf32, #tpu.memory_space<vmem>>, vector<64x128xf32>
    %cst = arith.constant dense<0.000000e+00> : vector<16x128xf32>
    %9 = tpu.matmul %7, %8, %cst {dimension_numbers = #tpu.dot_dimension_numbers<[1], [0], [0], [1], [0, 0, 1, 1], [], []>} : vector<16x64xf32>, vector<64x128xf32>, vector<16x128xf32> -> vector<16x128xf32>
    %c0_4 = arith.constant 0 : index
    %c0_5 = arith.constant 0 : index
    %10 = vector.load %arg3[%c0_4, %c0_5] : memref<8x128xf32, #tpu.memory_space<vmem>>, vector<8x128xf32>
    %11 = tpu.concatenate %10, %10 in 0 : vector<8x128xf32>, vector<8x128xf32> -> vector<16x128xf32>
    %12 = arith.addf %9, %11 : vector<16x128xf32>
    %c0_6 = arith.constant 0 : index
    %c0_7 = arith.constant 0 : index
    %13 = vector.load %arg4[%c0_6, %c0_7] : memref<16x128xf32, #tpu.memory_space<vmem>>, vector<16x128xf32>
    tpu.vector_store %arg4[%c0_6, %c0_7], %12 {strides = array<i32>} : memref<16x128xf32, #tpu.memory_space<vmem>>, vector<16x128xf32>,
    return
  }
  func.func @transform_0(%arg0: i32) -> (i32, i32, i32) {
    %c0_i32 = arith.constant 0 : i32
    %c0_i32_0 = arith.constant 0 : i32
    %c0_i32_1 = arith.constant 0 : i32
    return %arg0, %c0_i32, %c0_i32_0 : i32, i32, i32
  }
  func.func @transform_1(%arg0: i32) -> (i32, i32) {
    %c0_i32 = arith.constant 0 : i32
    %c0_i32_0 = arith.constant 0 : i32
    %c0_i32_1 = arith.constant 0 : i32
    return %c0_i32, %c0_i32_0 : i32, i32
  }
  func.func @transform_2(%arg0: i32) -> (i32, i32) {
    %c0_i32 = arith.constant 0 : i32
    %c0_i32_0 = arith.constant 0 : i32
    %c0_i32_1 = arith.constant 0 : i32
    return %c0_i32, %c0_i32_0 : i32, i32
  }
  func.func @transform_3(%arg0: i32) -> (i32, i32) {
    %c0_i32 = arith.constant 0 : i32
    %c0_i32_0 = arith.constant 0 : i32
    return %arg0, %c0_i32 : i32, i32
  }
}

</mosaic_0001>

<bundles_post_ra>
// kernel: tpu_custom_call.1
= control target key start
LH: loop header
LB: loop body
LE: loop exit
PB: predicated region body
PF: predicated region fallthrough
CT: control target
= control target key end

     0   :  { %8 = vsyncpa [#allocation3], 0  ;;  %s984_s0 = inlined_call_operand.hbm [shape: s32[2,1,16], index: 0, kind: input, shape index: {}]   ;;  %s985_s1 = inlined_call_operand.hbm [shape: f32[64,128], index: 1, kind: input, shape index: {}]   ;;  %s986_s2 = inlined_call_operand.hbm [shape: f32[8,128], index: 2, kind: input, shape index: {}]   ;;  %s987_s3 = inlined_call_operand.hbm [shape: f32[32,128], index: 3, kind: output, shape index: {}]  }
   0x1   :  { %10 = vsyncpa [#allocation3 + $0x1], 0 }
   0x2   :  { %11 = vsyncpa [#allocation6], 0 }
   0x3   :  { %12 = vsyncpa [#allocation4], 0 }
   0x4   :  { %14 = vsyncpa [#allocation4 + $0x1], 0  ;;  %s752_s12 = smov 0   ;;  %s754_s13 = smov 0  }
   0x5   :  { %s756_s14 = smov 0   ;;  %s758_s15 = smov 0  }
   0x6 LB: > { %s773_s16 = sadd.s32 4294967295, %s721_s15   ;;  %s427_s17 = sadd.s32 4294967294, %s721_s15   ;;  %s721_s15 = sphi %s758_s15, %s1007_s15   ;;  %s717_s14 = sphi %s756_s14, %s1006_s14   ;;  %s713_s13 = sphi %s754_s13, %s1005_s13   ;;  %s709_s12 = sphi %s752_s12, %s1004_s12  }
   0x7   : > { %p40_p0 = scmp.ne.s32.totalorder %s713_s13, %s709_s12  ;;  %p988_p1 = scmp.eq.s32.totalorder %s773_s16, 0 }
   0x8   : > { %p112_p3 = scmp.eq.s32.totalorder %s427_s17, 1  ;;  %p428_p5 = scmp.ge.s32.totalorder %s721_s15, 1 }
   0x9   : > { %p782_p4 = por %p988_p1, %p40_p0  ;;  %p119_p7 = scmp.lt.s32.totalorder %s721_s15, 3 }
   0xa   : > { %p787_p6 = por %p112_p3, %p40_p0  ;;  %s723_s21 = smov [#allocation5]  }
   0xb   : > { %s991_s18 = scalar_select %p782_p4, 1, 0 }
   0xc   : > { %s992_s19 = scalar_select %p787_p6, 1, 0 }
   0xd   : > { %p792_p8 = pnand %p428_p5, %p119_p7  ;;  %s131_s22 = sshll.u32 %s723_s21, 4  ;;  %s796_s22 = int_to_ptr.vmem [resolvable:$true] %s131_s22 }
   0xe   : > { %s724_s24 = smov [#allocation7]   ;;  %s565_s28 = scalar_lea.hbm %s985_s1, 1024 }
   0xf   : > { %p505_p9 = pneg %p792_p8  ;;  %s145_s25 = sshll.u32 %s724_s24, 4  ;;  %s807_s25 = int_to_ptr.vmem [resolvable:$true] %s145_s25 }
  0x10   : > { %p566_p12 = scmp.ne.s32.totalorder %s985_s1, %s565_s28  ;;  %p572_p5 = scmp.lt.u32.totalorder %s565_s28, %s985_s1 }
  0x11   : > { %p803_p11 = pnand %p505_p9, %p988_p1 }
  0x13   : > { %p567_p13 = pneg %p803_p11 }
  0x15   : > { %p568_p0 = pnand %p567_p13, %p566_p12 }
  0x17   : > { %p569_p3 = pneg %p568_p0 }
  0x19   : > { %p574_p7 = pnand %p572_p5, %p569_p3 }
  0x1b   : > { %577 = shalt.err (!%p574_p7)
}
  0x1c   : > { %s578_s6 = scalar_lea.vmem %s796_s22, 1024  ;;  %p586_p2 = scmp.lt.s32.totalorder %s796_s22, %s796_s22 }
  0x1d   : > { %p579_p9 = scmp.ne.s32.totalorder %s796_s22, %s578_s6  ;;  %p587_p12 = scmp.lt.s32.totalorder %s578_s6, %s578_s6 }
  0x1f   : > { %p581_p10 = pnand %p579_p9, %p567_p13  ;;  %p588_p0 = por %p587_p12, %p586_p2 }
  0x21   : > { %p582_p1 = pneg %p581_p10 }
  0x23   : > { %p589_p6 = pnand %p588_p0, %p582_p1 }
  0x25   : > { %592 = shalt.err (!%p589_p6)
}
  0x26   : > { %s725_s7 = smov 128   ;;  %s726_s8 = smov 8  }
  0x27   : > { %508 = dma.hbm_to_vmem [thread:$0]  (!%p803_p11), %s985_s1, 1024, %s796_s22, [#allocation6], %s725_s7, %s725_s7, %s726_s8  }
  0x28   : > { %s593_s21 = scalar_lea.hbm %s986_s2, 128 }
  0x29   : > { %p594_p2 = scmp.ne.s32.totalorder %s986_s2, %s593_s21  ;;  %p600_p10 = scmp.lt.u32.totalorder %s593_s21, %s986_s2 }
  0x2b   : > { %p596_p1 = pnand %p594_p2, %p567_p13 }
  0x2d   : > { %p597_p6 = pneg %p596_p1 }
  0x2f   : > { %p602_p3 = pnand %p600_p10, %p597_p6 }
  0x31   : > { %605 = shalt.err (!%p602_p3)
}
  0x32   : > { %s606_s22 = scalar_lea.vmem %s807_s25, 128  ;;  %p614_p12 = scmp.lt.s32.totalorder %s807_s25, %s807_s25 }
  0x33   : > { %p607_p5 = scmp.ne.s32.totalorder %s807_s25, %s606_s22  ;;  %p615_p0 = scmp.lt.s32.totalorder %s606_s22, %s606_s22 }
  0x35   : > { %p609_p7 = pnand %p607_p5, %p567_p13  ;;  %p616_p2 = por %p615_p0, %p614_p12 }
  0x37   : > { %p610_p9 = pneg %p609_p7 }
  0x39   : > { %p617_p1 = pnand %p616_p2, %p610_p9 }
  0x3b   : > { %620 = shalt.err (!%p617_p1)
}
  0x3c   : > { %511 = dma.hbm_to_vmem [thread:$0]  (!%p803_p11), %s986_s2, 128, %s807_s25, [#allocation6]  }
  0x3d   : > { %s862_s4 = sadd.s32 1, %s721_s15   ;;  %s27_s23 = sadd.s32 1, %s717_s14 }
  0x3e   : > { %s24_s5 = ssub.s32 %s721_s15, %s862_s4  ;;  %p34_p13 = scmp.ne.s32.totalorder %s717_s14, %s713_s13 }
  0x3f   : > { %p25_p6 = scmp.eq.s32.totalorder %s24_s5, 0  ;;  %p35_p10 = scmp.eq.s32.totalorder %s721_s15, 0 }
  0x40   : > { %p995_p3 = scmp.eq.s32.totalorder %s773_s16, 1  ;;  %p522_p7 = scmp.lt.s32.totalorder %s721_s15, 2 }
  0x41   : > { %s878_s7 = scalar_select %p25_p6, %s717_s14, %s27_s23  }
  0x42   : > { %p872_p5 = por %p995_p3, %p34_p13  ;;  %p36_p9 = por %p35_p10, %p34_p13 }
  0x43   : > { %s156_s8 = sand.u32 1, %s717_s14   ;;  %s432_s9 = sshll.u32 %s721_s15, 4 }
  0x44   : > { %s996_s6 = scalar_select %p872_p5, 1, 0 }
  0x45   : > { %s159_s25 = scalar_lea.vmem [#allocation2], %s156_s8  ;;  %s885_s21 = scalar_lea.hbm %s984_s0, %s432_s9 }
  0x46   : > { %s166_s10 = sshll.u32 %s159_s25, 4  ;;  %p889_p11 = pnand %p522_p7, %p36_p9  ;;  %s887_s10 = int_to_ptr.vmem [resolvable:$true] %s166_s10 }
  0x47   : > { %s157_s26 = scalar_lea.sflag [#allocation3], %s156_s8  ;;  %s621_s27 = scalar_lea.hbm %s885_s21, 16 }
  0x48   : > { %p622_p12 = scmp.ne.s32.totalorder %s885_s21, %s621_s27  ;;  %p623_p0 = pneg %p889_p11 }
  0x49   : > { %s626_s29 = scalar_lea.hbm %s984_s0, 32  ;;  %p627_p13 = scmp.lt.u32.totalorder %s885_s21, %s984_s0 }
  0x4a   : > { %p624_p2 = pnand %p623_p0, %p622_p12  ;;  %p628_p6 = scmp.lt.u32.totalorder %s626_s29, %s621_s27 }
  0x4b   : > { %p630_p3 = scmp.lt.u32.totalorder %s621_s27, %s885_s21 }
  0x4c   : > { %p625_p1 = pneg %p624_p2  ;;  %p629_p10 = por %p628_p6, %p627_p13 }
  0x4e   : > { %p631_p7 = por %p630_p3, %p629_p10 }
  0x50   : > { %p632_p9 = pnand %p631_p7, %p625_p1 }
  0x52   : > { %635 = shalt.err (!%p632_p9)
}
  0x53   : > { %s636_s5 = scalar_lea.vmem %s887_s10, 16  ;;  %s727_s8 = smov [#allocation2]  }
  0x54   : > { %p637_p12 = scmp.ne.s32.totalorder %s887_s10, %s636_s5  ;;  %s641_s9 = sshll.u32 %s727_s8, 4  ;;  %s642_s9 = int_to_ptr.vmem [resolvable:$false] %s641_s9 }
  0x55   : > { %s643_s25 = scalar_lea.vmem %s642_s9, 32  ;;  %p644_p4 = scmp.lt.s32.totalorder %s887_s10, %s642_s9 }
  0x56   : > { %p639_p2 = pnand %p637_p12, %p623_p0  ;;  %p645_p13 = scmp.lt.s32.totalorder %s643_s25, %s636_s5 }
  0x58   : > { %p640_p5 = pneg %p639_p2  ;;  %p646_p6 = por %p645_p13, %p644_p4 }
  0x5a   : > { %p647_p10 = pnand %p646_p6, %p640_p5 }
  0x5c   : > { %650 = shalt.err (!%p647_p10)
}
  0x5d   : > { %515 = dma.hbm_to_vmem [thread:$0]  (!%p889_p11), %s885_s21, 16, %s887_s10, %s157_s26  }
  0x5e   : > { %175 = sbr.rel (%p792_p8) target bundleno = 457 (0x1c9), region = 32  ;;  %s921_s11 = sand.u32 (!%p792_p8), 1, %s713_s13  }
  0x5f   : > { %s178_s17 = scalar_lea.sflag (!%p792_p8), [#allocation3], %s921_s11  ;;  %s180_s27 = scalar_lea.vmem (!%p792_p8), [#allocation2], %s921_s11 }
  0x60   : > { %p998_p0 = scmp.ne.s32.totalorder (!%p792_p8), %s991_s18, 0 }
  0x65   : > { %696 = dma.done.wait (%p998_p0), %s178_s17, 16  }
  0x66   : > { %698 = vsyncadd (%p998_p0), %s178_s17, 4294967280  ;;  %p999_p4 = scmp.eq.s32.totalorder %s773_s16, 0 }
  0x68   : > { %700 = dma.done.wait (%p999_p4), [#allocation6], 1152   ;;  %p1000_p5 = pmov %p999_p4 }
  0x69   : > { %v437_v0 = vld [vmem:[%s180_s27] ss:$0 sm:$0xff]  ;;  %v231_v1 = vld [vmem:[#allocation5] sm:$0xff]  ;;  %v232_v2 = vld [vmem:[#allocation5 + $0x8] sm:$0xff]  ;;  %v212_v13 = vlaneseq  ;;  %vm240_vm0 = vcmask 523264   ;;  %v728_v16 = vmov 0.0  }
  0x6a   : > { %702 = vsyncadd (%p1000_p5), [#allocation6], 4294966144  ;;  %219 = vbcast.lane.b32.xlu0 %v437_v0, 256  ;;  %v477_v3 = vpack.c.bf16 %v232_v2, %v231_v1  ;;  %v233_v4 = vld [vmem:[#allocation5 + $0x10] sm:$0xff]  ;;  %v234_v5 = vld [vmem:[#allocation5 + $0x18] sm:$0xff]  ;;  %s436_s18 = sshll.u32 %s921_s11, 4 }
  0x6b   : > { %v481_v6 = vpack.c.bf16 %v234_v5, %v233_v4  ;;  %v235_v7 = vld [vmem:[#allocation5 + $0x20] sm:$0xff]  ;;  %v236_v8 = vld [vmem:[#allocation5 + $0x28] sm:$0xff]  ;;  %v237_v10 = vld [vmem:[#allocation5 + $0x30] sm:$0xff]  ;;  %v213_v14 = vand.u32 127, %v212_v13  ;;  %s209_s20 = scalar_lea.vmem [#allocation8], %s436_s18  ;;  %s447_s21 = sshll.u32 %s773_s16, 8 }
  0x6c   : > { %478 = vmatprep.subr.bf16.mxu0 %v477_v3  ;;  %v485_v9 = vpack.c.bf16 %v236_v8, %v235_v7  ;;  %v238_v11 = vld [vmem:[#allocation5 + $0x38] sm:$0xff]  ;;  %s338_s10 = sshll.u32 %s209_s20, 4  ;;  %v239_v20 = vld [vmem:[#allocation7] sm:$0xff]  ;;  %s940_s28 = scalar_lea.hbm %s987_s3, %s447_s21  ;;  %s935_s10 = int_to_ptr.vmem [resolvable:$true] %s338_s10 }
  0x6d   : > { %480 = vmatpush3.bf16.msra.mxu0 %v477_v3  ;;  %v489_v12 = vpack.c.bf16 %v238_v11, %v237_v10  ;;  %s325_s22 = scalar_lea.sflag [#allocation4], %s921_s11  ;;  %s651_s29 = scalar_lea.vmem %s935_s10, 256 }
  0x6e   : > { %223 = vbcast.lane.b32.xlu0 %v437_v0, 264  ;;  %482 = vmatprep.subr.bf16.mxu0 %v481_v6  ;;  %p652_p8 = scmp.ne.s32.totalorder %s935_s10, %s651_s29  ;;  %p1001_p11 = scmp.ne.s32.totalorder %s996_s6, 0 }
  0x6f   : > { %s729_s16 = smov [#allocation8]  }
  0x70   : > { %p653_p1 = pnand %p652_p8, %p1001_p11  ;;  %s655_s30 = sshll.u32 %s729_s16, 4  ;;  %s656_s30 = int_to_ptr.vmem [resolvable:$false] %s655_s30 }
  0x71   : > { %484 = vmatpush3.bf16.msra.mxu0 %v481_v6  ;;  %s657_s23 = scalar_lea.vmem %s656_s30, 512  ;;  %p658_p7 = scmp.lt.s32.totalorder %s935_s10, %s656_s30 }
  0x72   : > { %486 = vmatprep.subr.bf16.mxu0 %v485_v9  ;;  %p654_p3 = pneg %p653_p1  ;;  %p659_p9 = scmp.lt.s32.totalorder %s657_s23, %s651_s29 }
  0x74   : > { %p660_p12 = por %p659_p9, %p658_p7 }
  0x75   : > { %488 = vmatpush3.bf16.msra.mxu0 %v485_v9 }
  0x76   : > { %490 = vmatprep.subr.bf16.mxu0 %v489_v12  ;;  %p661_p2 = pnand %p660_p12, %p654_p3 }
  0x79   : > { %492 = vmatpush3.bf16.msra.mxu0 %v489_v12 }
  0xdc   : > { %v220_v15 = vpop.permute.xlu0 %219 }
  0xdd   : > { %vm225_vm1 = vcmp.eq.s32.totalorder %v220_v15, %v213_v14 }
  0xde   : > { %v438_v17 = vsel %vm225_vm1, 1.0, %v728_v16 }
  0xdf   : > { %474 = vmatprep.mubr.msk.f32.mxu0 %vm240_vm0, %v438_v17 }
  0xe0   : > { %v224_v18 = vpop.permute.xlu0 %223 }
  0xe1   : > { %vm226_vm2 = vcmp.eq.s32.totalorder %v224_v18, %v213_v14 }
  0xe2   : > { %v439_v19 = vsel %vm226_vm2, 1.0, %v728_v16 }
  0xe3   : > { %475 = vmatmul.mubr.msk.f32.vlgmr.msra.gmra.mrb[0].mxu0 %vm240_vm0, %v439_v19 }
 0x1b6   : > { %v476_v21 = vpop.f32.mrb[0].mxu0 }
 0x1b7   : > { %v319_v22 = vadd.f32 %v476_v21, %v239_v20  ;;  %v313_v23 = vpop.f32.mrb[1].mxu0 }
 0x1b8   : > { %v314_v24 = vadd.f32 %v313_v23, %v239_v20 }
 0x1b9   : > { %323 = vst [vmem:[%s209_s20 + $0x8] sm:$0xff] %v319_v22 }
 0x1ba   : > { %322 = vst [vmem:[%s209_s20] sm:$0xff] %v314_v24 }
 0x1bb   : > { %664 = shalt.err (!%p661_p2)
}
 0x1bc   : > { %s665_s5 = scalar_lea.hbm %s940_s28, 256  ;;  %s669_s25 = scalar_lea.hbm %s987_s3, 512 }
 0x1bd   : > { %p666_p13 = scmp.ne.s32.totalorder %s940_s28, %s665_s5  ;;  %p670_p0 = scmp.lt.u32.totalorder %s940_s28, %s987_s3 }
 0x1be   : > { %p671_p4 = scmp.lt.u32.totalorder %s669_s25, %s665_s5  ;;  %p673_p8 = scmp.lt.u32.totalorder %s665_s5, %s940_s28 }
 0x1bf   : > { %p667_p6 = pnand %p666_p13, %p1001_p11 }
 0x1c0   : > { %p672_p5 = por %p671_p4, %p670_p0 }
 0x1c1   : > { %p668_p10 = pneg %p667_p6 }
 0x1c2   : > { %p674_p1 = por %p673_p8, %p672_p5 }
 0x1c4   : > { %p675_p3 = pnand %p674_p1, %p668_p10 }
 0x1c6   : > { %678 = shalt.err (!%p675_p3)
}
 0x1c7   : > { %s730_s18 = smov 128   ;;  %s731_s20 = smov 8  }
 0x1c8   : > { %503 = dma.vmem_to_hbm [thread:$0]  (%p1001_p11), %s935_s10, 256, %s940_s28, %s325_s22, %s730_s18, %s730_s18, %s731_s20  }
 0x1c9 PF: > { %s353_s21 = sand.u32 1, %s709_s12   ;;  %p1002_p7 = scmp.ne.s32.totalorder %s992_s19, 0 }
 0x1ca   : > { %p1003_p9 = scmp.ge.s32.totalorder %s721_s15, 2  ;;  %s354_s24 = scalar_lea.sflag [#allocation4], %s353_s21 }
 0x1cc   : > { %p517_p12 = pnand %p1003_p9, %p1002_p7 }
 0x1ce   : > { %704 = dma.done.wait (!%p517_p12), %s354_s24, 256  }
 0x1cf   : > { %706 = vsyncadd (!%p517_p12), %s354_s24, 4294967040  ;;  %p17_p2 = scmp.ge.s32.totalorder %s862_s4, 4   ;;  %s1004_s12 = smov %s713_s13 }
 0x1d0   : > { %s1005_s13 = smov %s717_s14  ;;  %s1006_s14 = smov %s878_s7 }
 0x1d1   : > { %s1007_s15 = smov %s862_s4  ;;  %19 = sbr.rel (!%p17_p2) target bundleno = 6 (0x6), region = 85 }
 0x1d8   :  { %359 = vsyncpa [#allocation3], 1 }
 0x1d9   :  { %361 = vsyncpa [#allocation3 + $0x1], 1 }
 0x1da   :  { %362 = vsyncpa [#allocation6], 1 }
 0x1db   :  { %363 = vsyncpa [#allocation4], 1 }
 0x1dc   :  { %365 = vsyncpa [#allocation4 + $0x1], 1 }

</bundles_post_ra>
